<compile_context>
chip_gen: v7x
topology: tpu7x:2x2x1
jax: 0.10.0
libtpu: 0.0.40
codegen_flags: <defaults>
</compile_context>

<pallas_src>
import functools
import math

import jax
import jax.numpy as jnp
from jax.experimental import pallas as pl
from jax.experimental.pallas import tpu as pltpu

_BN_EPS = 1e-5
_VMEM_LIMIT = 48 * 1024 * 1024     # <= 48 MiB: safe on v7x (64 MiB VMEM/TC), big on v5e/v6e


def _pick_tile(dim, target, align):
    """Largest tile <= target that divides dim and is a multiple of align; else full dim."""
    if dim <= target:
        return dim
    t = (target // align) * align
    while t >= align:
        if dim % t == 0:
            return t
        t -= align
    return dim


# ----------------------------- Pallas kernels -----------------------------

def _matmul_kernel(a_ref, b_ref, o_ref, acc_ref):
    @pl.when(pl.program_id(2) == 0)
    def _():
        acc_ref[...] = jnp.zeros_like(acc_ref)
    acc_ref[...] += jnp.dot(a_ref[...], b_ref[...],
                            preferred_element_type=jnp.float32)
    @pl.when(pl.program_id(2) == pl.num_programs(2) - 1)
    def _():
        o_ref[...] = acc_ref[...].astype(o_ref.dtype)


def pallas_matmul(a, b, *, tm_target=256, tn_target=256, tk_target=512):
    """bf16 x bf16 -> f32, tiled over (M, N) with a K-reduction grid axis."""
    m, k = a.shape
    k2, n = b.shape
    assert k == k2
    tm = _pick_tile(m, tm_target, 8)
    tn = _pick_tile(n, tn_target, 128)
    tk = _pick_tile(k, tk_target, 128)
    grid = (m // tm, n // tn, k // tk)
    return pl.pallas_call(
        _matmul_kernel,
        out_shape=jax.ShapeDtypeStruct((m, n), jnp.float32),
        grid=grid,
        in_specs=[pl.BlockSpec((tm, tk), lambda i, j, kk: (i, kk)),
                  pl.BlockSpec((tk, tn), lambda i, j, kk: (kk, j))],
        out_specs=pl.BlockSpec((tm, tn), lambda i, j, kk: (i, j)),
        scratch_shapes=[pltpu.VMEM((tm, tn), jnp.float32)],
        compiler_params=pltpu.CompilerParams(
            dimension_semantics=("parallel", "parallel", "arbitrary"),
            vmem_limit_bytes=_VMEM_LIMIT),
    )(a, b)


def _bn_stats_kernel(y_ref, s_ref, q_ref):
    y = y_ref[...]                                          # (tm, C) f32
    s = jnp.sum(y, axis=0, keepdims=True)
    q = jnp.sum(y * y, axis=0, keepdims=True)

    @pl.when(pl.program_id(0) == 0)
    def _():
        s_ref[...] = s
        q_ref[...] = q

    @pl.when(pl.program_id(0) > 0)
    def _():
        s_ref[...] = s_ref[...] + s
        q_ref[...] = q_ref[...] + q


def pallas_bn_stats(y):
    """Per-channel sum and sum-of-squares over all M rows (cross-tile accumulation)."""
    m, c = y.shape
    tm = _pick_tile(m, 512, 8)
    vec = pl.BlockSpec((1, c), lambda i: (0, 0))
    return pl.pallas_call(
        _bn_stats_kernel,
        out_shape=(jax.ShapeDtypeStruct((1, c), jnp.float32),
                   jax.ShapeDtypeStruct((1, c), jnp.float32)),
        grid=(m // tm,),
        in_specs=[pl.BlockSpec((tm, c), lambda i: (i, 0))],
        out_specs=(vec, vec),
        compiler_params=pltpu.CompilerParams(
            dimension_semantics=("arbitrary",),
            vmem_limit_bytes=_VMEM_LIMIT),
    )(y)


def _bn_apply_kernel(y_ref, s_ref, q_ref, g_ref, b_ref, o_ref, *, inv_m, relu):
    y = y_ref[...]                                          # (tm, C) f32
    mean = s_ref[...] * inv_m
    var = jnp.maximum(q_ref[...] * inv_m - mean * mean, 0.0)
    out = (y - mean) * jax.lax.rsqrt(var + _BN_EPS) * g_ref[...] + b_ref[...]
    if relu:
        out = jnp.maximum(out, 0.0)
    o_ref[...] = out.astype(o_ref.dtype)


def _bn_apply_res_kernel(y_ref, s_ref, q_ref, g_ref, b_ref, r_ref, o_ref, *, inv_m, relu):
    y = y_ref[...]
    mean = s_ref[...] * inv_m
    var = jnp.maximum(q_ref[...] * inv_m - mean * mean, 0.0)
    out = (y - mean) * jax.lax.rsqrt(var + _BN_EPS) * g_ref[...] + b_ref[...]
    out = out + r_ref[...].astype(jnp.float32)              # fused residual add
    if relu:
        out = jnp.maximum(out, 0.0)
    o_ref[...] = out.astype(o_ref.dtype)


def pallas_bn_apply(y, s, q, gamma, beta, *, relu, residual=None):
    """Normalize (batch stats) + scale/shift + optional residual add + optional ReLU."""
    m, c = y.shape
    tm = _pick_tile(m, 512, 8)
    row = pl.BlockSpec((tm, c), lambda i: (i, 0))
    vec = pl.BlockSpec((1, c), lambda i: (0, 0))
    inv_m = 1.0 / float(m)
    if residual is None:
        kern = functools.partial(_bn_apply_kernel, inv_m=inv_m, relu=relu)
        in_specs = [row, vec, vec, vec, vec]
        args = (y, s, q, gamma, beta)
    else:
        kern = functools.partial(_bn_apply_res_kernel, inv_m=inv_m, relu=relu)
        in_specs = [row, vec, vec, vec, vec, row]
        args = (y, s, q, gamma, beta, residual)
    return pl.pallas_call(
        kern,
        out_shape=jax.ShapeDtypeStruct((m, c), jnp.bfloat16),
        grid=(m // tm,),
        in_specs=in_specs,
        out_specs=row,
        compiler_params=pltpu.CompilerParams(
            dimension_semantics=("parallel",),
            vmem_limit_bytes=_VMEM_LIMIT),
    )(*args)


def _max9_kernel(*refs):
    o_ref = refs[-1]
    acc = refs[0][...]
    for r in refs[1:-1]:
        acc = jnp.maximum(acc, r[...])
    o_ref[...] = acc


def _pool_fc_kernel(x_ref, w_ref, b_ref, o_ref):
    x = x_ref[...].astype(jnp.float32)                      # (N, HW, C)
    pooled = jnp.mean(x, axis=1)                            # AdaptiveAvgPool2d(1)
    o_ref[...] = jnp.dot(pooled, w_ref[...],
                         preferred_element_type=jnp.float32) + b_ref[...]


def pallas_pool_fc(x3, w, b):
    n, hw, c = x3.shape
    nc = w.shape[1]
    return pl.pallas_call(
        _pool_fc_kernel,
        out_shape=jax.ShapeDtypeStruct((n, nc), jnp.float32),
        grid=(1,),
        in_specs=[pl.BlockSpec((n, hw, c), lambda i: (0, 0, 0)),
                  pl.BlockSpec((c, nc), lambda i: (0, 0)),
                  pl.BlockSpec((1, nc), lambda i: (0, 0))],
        out_specs=pl.BlockSpec((n, nc), lambda i: (0, 0)),
        compiler_params=pltpu.CompilerParams(
            dimension_semantics=("arbitrary",),
            vmem_limit_bytes=_VMEM_LIMIT),
    )(x3, w, b)


# --------------------------- glue: conv / pool -----------------------------

def _im2col(x, kh, kw, stride, pad):
    """x: NHWC bf16.  Returns ((N*Ho*Wo, kh*kw*C), (N, Ho, Wo)).  Patch order = (kh, kw, C)."""
    n, h, w, c = x.shape
    ho = (h + 2 * pad - kh) // stride + 1
    wo = (w + 2 * pad - kw) // stride + 1
    if pad:
        x = jnp.pad(x, ((0, 0), (pad, pad), (pad, pad), (0, 0)))
    if kh == 1 and kw == 1:
        patches = x[:, ::stride, ::stride, :][:, :ho, :wo, :]
        return patches.reshape(n * ho * wo, c), (n, ho, wo)
    cols = [x[:, i:i + stride * ho:stride, j:j + stride * wo:stride, :]
            for i in range(kh) for j in range(kw)]
    patches = jnp.concatenate(cols, axis=-1)                # (N, Ho, Wo, kh*kw*C)
    return patches.reshape(n * ho * wo, kh * kw * c), (n, ho, wo)


def conv_bn(x, p, *, relu, residual=None):
    """x: NHWC bf16; p holds the pre-transposed bf16 (K, Cout) weight + BN params.
    conv (no bias) -> BN (batch stats) [-> + residual] [-> ReLU]."""
    patches, (n, ho, wo) = _im2col(x, p['kh'], p['kw'], p['stride'], p['pad'])
    y = pallas_matmul(patches, p['wmat'])                   # (M, Cout) f32
    s, q = pallas_bn_stats(y)
    res = None if residual is None else residual.reshape(n * ho * wo, p['cout'])
    out = pallas_bn_apply(y, s, q, p['gamma'], p['beta'], relu=relu, residual=res)
    return out.reshape(n, ho, wo, p['cout'])                # bf16


def maxpool_3x3_s2(x):
    n, h, w, c = x.shape
    k, stride, pad = 3, 2, 1
    ho = (h + 2 * pad - k) // stride + 1
    wo = (w + 2 * pad - k) // stride + 1
    xp = jnp.pad(x, ((0, 0), (pad, pad), (pad, pad), (0, 0)),
                 constant_values=-jnp.inf)
    wins = [xp[:, i:i + stride * ho:stride, j:j + stride * wo:stride, :]
            .reshape(n * ho * wo, c)
            for i in range(k) for j in range(k)]
    m = n * ho * wo
    tm = _pick_tile(m, 512, 8)
    row = pl.BlockSpec((tm, c), lambda i: (i, 0))
    out = pl.pallas_call(
        _max9_kernel,
        out_shape=jax.ShapeDtypeStruct((m, c), x.dtype),
        grid=(m // tm,),
        in_specs=[row] * 9,
        out_specs=row,
        compiler_params=pltpu.CompilerParams(
            dimension_semantics=("parallel",),
            vmem_limit_bytes=_VMEM_LIMIT),
    )(*wins)
    return out.reshape(n, ho, wo, c)


# ------------------------------ ResNet-50 ----------------------------------

def bottleneck(x, blk):
    out = conv_bn(x, blk['conv1'], relu=True)
    out = conv_bn(out, blk['conv2'], relu=True)
    if 'downsample' in blk:
        identity = conv_bn(x, blk['downsample'], relu=False)
    else:
        identity = x
    # BN3 + residual add + ReLU fused in one pass
    return conv_bn(out, blk['conv3'], relu=True, residual=identity)


def gray_resnet_forward(params, x_nchw):
    # NCHW (PyTorch) -> NHWC (kernel layout), activations stored in bf16
    x = jnp.transpose(x_nchw, (0, 2, 3, 1)).astype(jnp.bfloat16)
    x = conv_bn(x, params['conv1'], relu=True)
    x = maxpool_3x3_s2(x)
    for blocks in params['layers']:
        for blk in blocks:
            x = bottleneck(x, blk)
    n, h, w, c = x.shape
    return pallas_pool_fc(x.reshape(n, h * w, c), params['fc_w'], params['fc_b'])


# ------------------------- deterministic parameters ------------------------

def _conv_param(key, cout, cin, kh, kw, stride, pad):
    # kaiming_normal(mode='fan_out', relu); weight pre-transposed to (kh*kw*cin, cout) bf16
    fan_out = cout * kh * kw
    w = jax.random.normal(key, (cout, cin, kh, kw), jnp.float32) * math.sqrt(2.0 / fan_out)
    wmat = jnp.transpose(w, (2, 3, 1, 0)).reshape(kh * kw * cin, cout).astype(jnp.bfloat16)
    return {'wmat': wmat, 'kh': kh, 'kw': kw, 'stride': stride, 'pad': pad, 'cout': cout,
            'gamma': jnp.ones((1, cout), jnp.float32),
            'beta': jnp.zeros((1, cout), jnp.float32)}


def make_params(key, in_channels=1, n_class=1):
    # ResNet-50: Bottleneck blocks (3, 4, 6, 3), widths (64, 128, 256, 512), expansion 4.
    cfg = [(3, 64, 1), (4, 128, 2), (6, 256, 2), (3, 512, 2)]
    expansion = 4
    keys = iter(jax.random.split(key, 64))
    params = {'conv1': _conv_param(next(keys), 64, in_channels, 7, 7, 2, 3), 'layers': []}
    c_in = 64
    for n_blocks, width, stride in cfg:
        c_out = width * expansion
        blocks = []
        for bi in range(n_blocks):
            s = stride if bi == 0 else 1
            blk = {'conv1': _conv_param(next(keys), width, c_in, 1, 1, 1, 0),
                   'conv2': _conv_param(next(keys), width, width, 3, 3, s, 1),
                   'conv3': _conv_param(next(keys), c_out, width, 1, 1, 1, 0)}
            if bi == 0:
                blk['downsample'] = _conv_param(next(keys), c_out, c_in, 1, 1, s, 0)
            blocks.append(blk)
            c_in = c_out
        params['layers'].append(blocks)
    params['fc_w'] = jax.random.normal(next(keys), (c_in, n_class), jnp.float32) * 0.01
    params['fc_b'] = jnp.zeros((1, n_class), jnp.float32)
    return params


# ----------------------------------- main -----------------------------------

if __name__ == "__main__":
    key = jax.random.PRNGKey(0)
    pkey, xkey = jax.random.split(key)
    params = make_params(pkey, in_channels=1, n_class=1)
    # NCHW input, grayscale (in_channels=1), small spatial 16x16
    x = jax.random.normal(xkey, (2, 1, 16, 16), jnp.float32)
    out = gray_resnet_forward(params, x)
    out = jax.block_until_ready(out)
    assert out.shape == (2, 1) and out.dtype == jnp.float32
    print("KERNEL_OK")
</pallas_src>

<mosaic_0001>
module attributes {stable_mosaic.version = 11 : i64} {
  func.func @_matmul_kernel(%arg0: i32, %arg1: i32, %arg2: i32, %arg3: memref<128x49xbf16, #tpu.memory_space<vmem>>, %arg4: memref<49x64xbf16, #tpu.memory_space<vmem>>, %arg5: memref<128x64xf32, #tpu.memory_space<vmem>>, %arg6: memref<128x64xf32, #tpu.memory_space<vmem>>) attributes {dimension_semantics = [#tpu.dimension_semantics<parallel>, #tpu.dimension_semantics<parallel>, #tpu.dimension_semantics<arbitrary>], iteration_bounds = array<i64: 1, 1, 1>, scalar_prefetch = 0 : i64, scratch_operands = 1 : i64, tpu.core_type = #tpu.core_type<tc>, window_params = [{transform_indices = @transform_0, window_bounds = array<i64: 128, 49>}, {transform_indices = @transform_1, window_bounds = array<i64: 49, 64>}, {transform_indices = @transform_2, window_bounds = array<i64: 128, 64>}]} {
    %c0_i32 = arith.constant 0 : i32
    %0 = arith.cmpi eq, %arg2, %c0_i32 : i32
    %1 = arith.extui %0 : i1 to i32
    %c0_i32_0 = arith.constant 0 : i32
    %2 = arith.cmpi ne, %1, %c0_i32_0 : i32
    scf.if %2 {
      %cst_10 = arith.constant 0.000000e+00 : f32
      %12 = vector.broadcast %cst_10 : f32 to vector<128x64xf32>
      %c0_11 = arith.constant 0 : index
      %c0_12 = arith.constant 0 : index
      %13 = vector.load %arg6[%c0_11, %c0_12] : memref<128x64xf32, #tpu.memory_space<vmem>>, vector<128x64xf32>
      tpu.vector_store %arg6[%c0_11, %c0_12], %12 {strides = array<i32>} : memref<128x64xf32, #tpu.memory_space<vmem>>, vector<128x64xf32>,
    } else {
    }
    %c0 = arith.constant 0 : index
    %c0_1 = arith.constant 0 : index
    %3 = vector.load %arg6[%c0, %c0_1] : memref<128x64xf32, #tpu.memory_space<vmem>>, vector<128x64xf32>
    %c0_2 = arith.constant 0 : index
    %c0_3 = arith.constant 0 : index
    %4 = vector.load %arg3[%c0_2, %c0_3] : memref<128x49xbf16, #tpu.memory_space<vmem>>, vector<128x49xbf16>
    %c0_4 = arith.constant 0 : index
    %c0_5 = arith.constant 0 : index
    %5 = vector.load %arg4[%c0_4, %c0_5] : memref<49x64xbf16, #tpu.memory_space<vmem>>, vector<49x64xbf16>
    %cst = arith.constant dense<0.000000e+00> : vector<128x64xf32>
    %6 = tpu.matmul %4, %5, %cst {dimension_numbers = #tpu.dot_dimension_numbers<[1], [0], [0], [1], [0, 0, 1, 1], [], []>} : vector<128x49xbf16>, vector<49x64xbf16>, vector<128x64xf32> -> vector<128x64xf32>
    %7 = arith.addf %3, %6 : vector<128x64xf32>
    %c0_6 = arith.constant 0 : index
    %c0_7 = arith.constant 0 : index
    %8 = vector.load %arg6[%c0_6, %c0_7] : memref<128x64xf32, #tpu.memory_space<vmem>>, vector<128x64xf32>
    tpu.vector_store %arg6[%c0_6, %c0_7], %7 {strides = array<i32>} : memref<128x64xf32, #tpu.memory_space<vmem>>, vector<128x64xf32>,
    %c0_i32_8 = arith.constant 0 : i32
    %9 = arith.cmpi eq, %arg2, %c0_i32_8 : i32
    %10 = arith.extui %9 : i1 to i32
    %c0_i32_9 = arith.constant 0 : i32
    %11 = arith.cmpi ne, %10, %c0_i32_9 : i32
    scf.if %11 {
      %c0_10 = arith.constant 0 : index
      %c0_11 = arith.constant 0 : index
      %12 = vector.load %arg6[%c0_10, %c0_11] : memref<128x64xf32, #tpu.memory_space<vmem>>, vector<128x64xf32>
      %c0_12 = arith.constant 0 : index
      %c0_13 = arith.constant 0 : index
      %13 = vector.load %arg5[%c0_12, %c0_13] : memref<128x64xf32, #tpu.memory_space<vmem>>, vector<128x64xf32>
      tpu.vector_store %arg5[%c0_12, %c0_13], %12 {strides = array<i32>} : memref<128x64xf32, #tpu.memory_space<vmem>>, vector<128x64xf32>,
    } else {
    }
    return
  }
  func.func @transform_0(%arg0: i32, %arg1: i32, %arg2: i32) -> (i32, i32) {
    %c0_i32 = arith.constant 0 : i32
    return %arg0, %arg2 : i32, i32
  }
  func.func @transform_1(%arg0: i32, %arg1: i32, %arg2: i32) -> (i32, i32) {
    %c0_i32 = arith.constant 0 : i32
    return %arg2, %arg1 : i32, i32
  }
  func.func @transform_2(%arg0: i32, %arg1: i32, %arg2: i32) -> (i32, i32) {
    %c0_i32 = arith.constant 0 : i32
    return %arg0, %arg1 : i32, i32
  }
}

</mosaic_0001>

<bundles_post_ra>
// kernel: tpu_custom_call.1
= control target key start
LH: loop header
LB: loop body
LE: loop exit
PB: predicated region body
PF: predicated region fallthrough
CT: control target
= control target key end

     0   :  { %vm158_vm0 = vcmask 1040384   ;;  %vm16_vm1 = vcmask 523264   ;;  %vm133_vm2 = vcmask 400384   ;;  %v411_v3 = vmov 0.0   ;;  %s569_s1 = inlined_call_operand.vmem [shape: bf16[49,64], index: 1, kind: input, shape index: {}]   ;;  %s570_s0 = inlined_call_operand.vmem [shape: bf16[128,49], index: 0, kind: input, shape index: {}]   ;;  %s571_s2 = inlined_call_operand.vmem [shape: f32[128,64], index: 2, kind: output, shape index: {}]  }
   0x1   :  { %v399_v0 = vld [vmem:[%s569_s1] sm:$0xff]   ;;  %v400_v1 = vld [vmem:[%s569_s1 + $0x8] sm:$0xff]   ;;  %v401_v2 = vld [vmem:[%s569_s1 + $0x10] sm:$0xff]   ;;  %19 = vst.msk [vmem:[#allocation2 + $0x10] sm:$0xff] %vm16_vm1, %v411_v3  ;;  %v412_v6 = vmov 0  }
   0x2   :  { %365 = vmatprep.subr.bf16.mxu0 %v399_v0  ;;  %389 = vmatprep.subr.bf16.mxu1 %v399_v0  ;;  %17 = vst.msk [vmem:[#allocation2] sm:$0xff] %vm16_vm1, %v411_v3  ;;  %18 = vst.msk [vmem:[#allocation2 + $0x8] sm:$0xff] %vm16_vm1, %v411_v3  ;;  %v402_v4 = vld [vmem:[%s569_s1 + $0x18] ss:$0 sps:$4 sm:$0x11]   ;;  %v403_v5 = vld [vmem:[%s570_s0] sm:$0xff]  }
   0x3   :  { %20 = vst.msk [vmem:[#allocation2 + $0x18] sm:$0xff] %vm16_vm1, %v411_v3  ;;  %21 = vst.msk [vmem:[#allocation2 + $0x20] sm:$0xff] %vm16_vm1, %v411_v3  ;;  %366 = vmatpush3.bf16.msra.mxu0 %v399_v0  ;;  %393 = vmatpush3.bf16.msra.mxu1 %v399_v0  ;;  %v160_v7 = vsel %vm158_vm0, 65535, %v412_v6  ;;  %v404_v8 = vld [vmem:[%s570_s0 + $0x20] sm:$0xff]   ;;  %v405_v10 = vld [vmem:[%s570_s0 + $0x8] sm:$0xff]  }
   0x4   :  { %22 = vst.msk [vmem:[#allocation2 + $0x28] sm:$0xff] %vm16_vm1, %v411_v3  ;;  %23 = vst.msk [vmem:[#allocation2 + $0x30] sm:$0xff] %vm16_vm1, %v411_v3  ;;  %367 = vmatprep.subr.bf16.mxu0 %v400_v1  ;;  %390 = vmatprep.subr.bf16.mxu1 %v400_v1  ;;  %v162_v9 = vand.u32 %v402_v4, %v160_v7  ;;  %v406_v11 = vld [vmem:[%s570_s0 + $0x28] sm:$0xff]   ;;  %v407_v12 = vld [vmem:[%s570_s0 + $0x10] sm:$0xff]  }
   0x5   :  { %24 = vst.msk [vmem:[#allocation2 + $0x38] sm:$0xff] %vm16_vm1, %v411_v3  ;;  %25 = vst.msk [vmem:[#allocation2 + $0x40] sm:$0xff] %vm16_vm1, %v411_v3  ;;  %373 = vmatprep.mubr.msk.bf16.mxu0 %vm133_vm2, %v403_v5  ;;  %381 = vmatprep.mubr.msk.bf16.mxu1 %vm133_vm2, %v404_v8  ;;  %v408_v13 = vld [vmem:[%s570_s0 + $0x30] sm:$0xff]   ;;  %v409_v14 = vld [vmem:[%s570_s0 + $0x18] sm:$0xff]  }
   0x6   :  { %26 = vst.msk [vmem:[#allocation2 + $0x48] sm:$0xff] %vm16_vm1, %v411_v3  ;;  %27 = vst.msk [vmem:[#allocation2 + $0x50] sm:$0xff] %vm16_vm1, %v411_v3  ;;  %v410_v15 = vld [vmem:[%s570_s0 + $0x38] sm:$0xff]  }
   0x7   :  { %28 = vst.msk [vmem:[#allocation2 + $0x58] sm:$0xff] %vm16_vm1, %v411_v3  ;;  %29 = vst.msk [vmem:[#allocation2 + $0x60] sm:$0xff] %vm16_vm1, %v411_v3  ;;  %368 = vmatpush3.bf16.msra.mxu0 %v400_v1  ;;  %394 = vmatpush3.bf16.msra.mxu1 %v400_v1 }
   0x8   :  { %30 = vst.msk [vmem:[#allocation2 + $0x68] sm:$0xff] %vm16_vm1, %v411_v3  ;;  %31 = vst.msk [vmem:[#allocation2 + $0x70] sm:$0xff] %vm16_vm1, %v411_v3  ;;  %369 = vmatprep.subr.bf16.mxu0 %v401_v2  ;;  %391 = vmatprep.subr.bf16.mxu1 %v401_v2  ;;  %v35_v16 = vld [vmem:[#allocation2 + $0x10] sm:$0xff] }
   0x9   :  { %32 = vst.msk [vmem:[#allocation2 + $0x78] sm:$0xff] %vm16_vm1, %v411_v3  ;;  %v33_v18 = vld [vmem:[#allocation2] sm:$0xff]  ;;  %v34_v28 = vld [vmem:[#allocation2 + $0x8] sm:$0xff] }
   0xa   :  { %v36_v22 = vld [vmem:[#allocation2 + $0x18] sm:$0xff]  ;;  %v37_v42 = vld [vmem:[#allocation2 + $0x20] sm:$0xff] }
   0xb   :  { %370 = vmatpush3.bf16.msra.mxu0 %v401_v2  ;;  %395 = vmatpush3.bf16.msra.mxu1 %v401_v2  ;;  %v39_v40 = vld [vmem:[#allocation2 + $0x30] sm:$0xff]  ;;  %v38_v52 = vld [vmem:[#allocation2 + $0x28] sm:$0xff] }
   0xc   :  { %371 = vmatprep.subr.bf16.mxu0 %v162_v9  ;;  %392 = vmatprep.subr.bf16.mxu1 %v162_v9  ;;  %v41_v19 = vld [vmem:[#allocation2 + $0x40] sm:$0xff]  ;;  %v40_v46 = vld [vmem:[#allocation2 + $0x38] sm:$0xff] }
   0xd   :  { %v43_v17 = vld [vmem:[#allocation2 + $0x50] sm:$0xff]  ;;  %v42_v29 = vld [vmem:[#allocation2 + $0x48] sm:$0xff] }
   0xe   :  { %v44_v23 = vld [vmem:[#allocation2 + $0x58] sm:$0xff]  ;;  %v45_v43 = vld [vmem:[#allocation2 + $0x60] sm:$0xff] }
   0xf   :  { %372 = vmatpush3.bf16.msra.mxu0 %v162_v9  ;;  %396 = vmatpush3.bf16.msra.mxu1 %v162_v9  ;;  %v47_v41 = vld [vmem:[#allocation2 + $0x70] sm:$0xff]  ;;  %v46_v53 = vld [vmem:[#allocation2 + $0x68] sm:$0xff] }
  0x10   :  { %v48_v47 = vld [vmem:[#allocation2 + $0x78] sm:$0xff] }
  0x12   :  { %374 = vmatmul.mubr.msk.bf16.vlgmr.msra.gmra.mrb[0].mxu0 %vm133_vm2, %v405_v10  ;;  %382 = vmatmul.mubr.msk.bf16.vlgmr.msra.gmra.mrb[0].mxu1 %vm133_vm2, %v406_v11 }
  0x13   :  { %377 = vmatprep.mubr.msk.bf16.mxu0 %vm133_vm2, %v407_v12  ;;  %385 = vmatprep.mubr.msk.bf16.mxu1 %vm133_vm2, %v408_v13 }
  0x1a   :  { %378 = vmatmul.mubr.msk.bf16.gmra.mrb[4].mxu0 %vm133_vm2, %v409_v14  ;;  %386 = vmatmul.mubr.msk.bf16.gmra.mrb[4].mxu1 %vm133_vm2, %v410_v15 }
  0xe5   :  { %v375_v20 = vpop.f32.mrb[0].mxu0  ;;  %v383_v21 = vpop.f32.mrb[0].mxu1 }
  0xe6   :  { %v263_v24 = vadd.f32 %v375_v20, %v35_v16  ;;  %v271_v25 = vadd.f32 %v383_v21, %v43_v17  ;;  %v198_v26 = vpop.f32.mrb[1].mxu0  ;;  %v230_v27 = vpop.f32.mrb[1].mxu1 }
  0xe7   :  { %v261_v30 = vadd.f32 %v198_v26, %v33_v18  ;;  %v269_v31 = vadd.f32 %v230_v27, %v41_v19  ;;  %v376_v32 = vpop.f32.mrb[2].mxu0  ;;  %v384_v33 = vpop.f32.mrb[2].mxu1 }
  0xe8   :  { %280 = vst.msk [vmem:[#allocation2 + $0x10] sm:$0xff] %vm16_vm1, %v263_v24  ;;  %288 = vst.msk [vmem:[#allocation2 + $0x50] sm:$0xff] %vm16_vm1, %v271_v25  ;;  %v264_v34 = vadd.f32 %v376_v32, %v36_v22  ;;  %v272_v35 = vadd.f32 %v384_v33, %v44_v23  ;;  %v201_v36 = vpop.f32.mrb[3].mxu0  ;;  %v233_v37 = vpop.f32.mrb[3].mxu1 }
  0xe9   :  { %278 = vst.msk [vmem:[#allocation2] sm:$0xff] %vm16_vm1, %v261_v30  ;;  %286 = vst.msk [vmem:[#allocation2 + $0x40] sm:$0xff] %vm16_vm1, %v269_v31  ;;  %v262_v38 = vadd.f32 %v201_v36, %v34_v28  ;;  %v270_v39 = vadd.f32 %v233_v37, %v42_v29 }
  0xea   :  { %281 = vst.msk [vmem:[#allocation2 + $0x18] sm:$0xff] %vm16_vm1, %v264_v34  ;;  %289 = vst.msk [vmem:[#allocation2 + $0x58] sm:$0xff] %vm16_vm1, %v272_v35 }
  0xeb   :  { %279 = vst.msk [vmem:[#allocation2 + $0x8] sm:$0xff] %vm16_vm1, %v262_v38  ;;  %287 = vst.msk [vmem:[#allocation2 + $0x48] sm:$0xff] %vm16_vm1, %v270_v39 }
  0xed   :  { %v379_v44 = vpop.f32.mrb[4].mxu0  ;;  %v387_v45 = vpop.f32.mrb[4].mxu1 }
  0xee   :  { %v267_v48 = vadd.f32 %v379_v44, %v39_v40  ;;  %v275_v49 = vadd.f32 %v387_v45, %v47_v41  ;;  %v214_v50 = vpop.f32.mrb[5].mxu0  ;;  %v246_v51 = vpop.f32.mrb[5].mxu1 }
  0xef   :  { %v299_v54 = vld [vmem:[#allocation2 + $0x10] sm:$0xff]  ;;  %v265_v56 = vadd.f32 %v214_v50, %v37_v42  ;;  %v273_v57 = vadd.f32 %v246_v51, %v45_v43  ;;  %v380_v58 = vpop.f32.mrb[6].mxu0  ;;  %v388_v59 = vpop.f32.mrb[6].mxu1 }
  0xf0   :  { %v307_v55 = vld [vmem:[#allocation2 + $0x50] sm:$0xff]  ;;  %315 = vst.msk [vmem:[%s571_s2 + $0x10] sm:$0xff] %vm16_vm1, %v299_v54  ;;  %v297_v60 = vld [vmem:[#allocation2] sm:$0xff]  ;;  %284 = vst.msk [vmem:[#allocation2 + $0x30] sm:$0xff] %vm16_vm1, %v267_v48  ;;  %v268_v62 = vadd.f32 %v380_v58, %v40_v46  ;;  %v276_v63 = vadd.f32 %v388_v59, %v48_v47  ;;  %v217_v0 = vpop.f32.mrb[7].mxu0  ;;  %v249_v1 = vpop.f32.mrb[7].mxu1 }
  0xf1   :  { %323 = vst.msk [vmem:[%s571_s2 + $0x50] sm:$0xff] %vm16_vm1, %v307_v55  ;;  %v305_v61 = vld [vmem:[#allocation2 + $0x40] sm:$0xff]  ;;  %292 = vst.msk [vmem:[#allocation2 + $0x70] sm:$0xff] %vm16_vm1, %v275_v49  ;;  %v300_v2 = vld [vmem:[#allocation2 + $0x18] sm:$0xff]  ;;  %v266_v4 = vadd.f32 %v217_v0, %v38_v52  ;;  %v274_v5 = vadd.f32 %v249_v1, %v46_v53 }
  0xf2   :  { %313 = vst.msk [vmem:[%s571_s2] sm:$0xff] %vm16_vm1, %v297_v60  ;;  %321 = vst.msk [vmem:[%s571_s2 + $0x40] sm:$0xff] %vm16_vm1, %v305_v61  ;;  %v308_v3 = vld [vmem:[#allocation2 + $0x58] sm:$0xff]  ;;  %v298_v6 = vld [vmem:[#allocation2 + $0x8] sm:$0xff] }
  0xf3   :  { %282 = vst.msk [vmem:[#allocation2 + $0x20] sm:$0xff] %vm16_vm1, %v265_v56  ;;  %290 = vst.msk [vmem:[#allocation2 + $0x60] sm:$0xff] %vm16_vm1, %v273_v57  ;;  %v306_v7 = vld [vmem:[#allocation2 + $0x48] sm:$0xff] }
  0xf4   :  { %316 = vst.msk [vmem:[%s571_s2 + $0x18] sm:$0xff] %vm16_vm1, %v300_v2  ;;  %324 = vst.msk [vmem:[%s571_s2 + $0x58] sm:$0xff] %vm16_vm1, %v308_v3 }
  0xf5   :  { %285 = vst.msk [vmem:[#allocation2 + $0x38] sm:$0xff] %vm16_vm1, %v268_v62  ;;  %293 = vst.msk [vmem:[#allocation2 + $0x78] sm:$0xff] %vm16_vm1, %v276_v63 }
  0xf6   :  { %314 = vst.msk [vmem:[%s571_s2 + $0x8] sm:$0xff] %vm16_vm1, %v298_v6  ;;  %322 = vst.msk [vmem:[%s571_s2 + $0x48] sm:$0xff] %vm16_vm1, %v306_v7 }
  0xf7   :  { %283 = vst.msk [vmem:[#allocation2 + $0x28] sm:$0xff] %vm16_vm1, %v266_v4  ;;  %291 = vst.msk [vmem:[#allocation2 + $0x68] sm:$0xff] %vm16_vm1, %v274_v5  ;;  %v303_v8 = vld [vmem:[#allocation2 + $0x30] sm:$0xff] }
  0xf8   :  { %v311_v9 = vld [vmem:[#allocation2 + $0x70] sm:$0xff]  ;;  %319 = vst.msk [vmem:[%s571_s2 + $0x30] sm:$0xff] %vm16_vm1, %v303_v8 }
  0xf9   :  { %327 = vst.msk [vmem:[%s571_s2 + $0x70] sm:$0xff] %vm16_vm1, %v311_v9 }
  0xfa   :  { %v301_v10 = vld [vmem:[#allocation2 + $0x20] sm:$0xff] }
  0xfb   :  { %v309_v11 = vld [vmem:[#allocation2 + $0x60] sm:$0xff]  ;;  %317 = vst.msk [vmem:[%s571_s2 + $0x20] sm:$0xff] %vm16_vm1, %v301_v10 }
  0xfc   :  { %325 = vst.msk [vmem:[%s571_s2 + $0x60] sm:$0xff] %vm16_vm1, %v309_v11  ;;  %v304_v12 = vld [vmem:[#allocation2 + $0x38] sm:$0xff] }
  0xfd   :  { %v312_v13 = vld [vmem:[#allocation2 + $0x78] sm:$0xff]  ;;  %320 = vst.msk [vmem:[%s571_s2 + $0x38] sm:$0xff] %vm16_vm1, %v304_v12 }
  0xfe   :  { %328 = vst.msk [vmem:[%s571_s2 + $0x78] sm:$0xff] %vm16_vm1, %v312_v13  ;;  %v302_v14 = vld [vmem:[#allocation2 + $0x28] sm:$0xff] }
  0xff   :  { %v310_v15 = vld [vmem:[#allocation2 + $0x68] sm:$0xff]  ;;  %318 = vst.msk [vmem:[%s571_s2 + $0x28] sm:$0xff] %vm16_vm1, %v302_v14 }
 0x100   :  { %326 = vst.msk [vmem:[%s571_s2 + $0x68] sm:$0xff] %vm16_vm1, %v310_v15 }

</bundles_post_ra>
